<compile_context>
chip_gen: v5e
topology: v5e:2x2
jax: 0.10.0
libtpu: 0.0.40
codegen_flags: <defaults>
</compile_context>

<pallas_src>
import functools

import jax
import jax.numpy as jnp
from jax.experimental import pallas as pl
from jax.experimental.pallas import tpu as pltpu


_VMEM_BLOCK_BUDGET = 24 * 1024 * 1024   # 2 inputs x 2 pipeline buffers per block
_VMEM_LIMIT_BYTES = 32 * 1024 * 1024    # safe scoped limit on v5e/v6e (128 MiB) and v7x (64 MiB)


def _penalty_kernel(loss_ref, sample_ref, latency_ref, out_ref, acc_ref,
                    *, baseline, scale, nonlinear, aggregate):
    d = pl.program_id(0)

    @pl.when(d == 0)
    def _():
        acc_ref[...] = jnp.zeros_like(acc_ref)

    # Expected-latency profiler block: cast in-kernel (inputs may be bf16),
    # multiply on the VPU, reduce along the sublane (decision) axis only.
    prod = sample_ref[...].astype(jnp.float32) * latency_ref[...].astype(jnp.float32)
    acc_ref[...] += jnp.sum(prod, axis=0, keepdims=True)  # (1, O) partial sums

    @pl.when(d == pl.num_programs(0) - 1)
    def _():
        # The only cross-lane (XLU) reduce in the whole kernel.
        penalty = jnp.sum(acc_ref[...])

        # normalized_penalty = nonlinear(penalty / baseline - 1)
        npen = penalty / jnp.float32(baseline) - jnp.float32(1.0)
        if nonlinear == 'linear':
            pass
        elif nonlinear == 'positive':
            npen = jnp.maximum(npen, 0.0)
        elif nonlinear == 'negative':
            npen = jnp.minimum(npen, 0.0)     # == -relu(-x)
        elif nonlinear == 'absolute':
            npen = jnp.abs(npen)
        else:
            raise ValueError(f'Invalid nonlinear: {nonlinear}')

        loss = loss_ref[0]                    # scalar load from SMEM
        if aggregate == 'add':
            loss_new = loss + jnp.float32(scale) * npen
        elif aggregate == 'mul':
            base = npen + jnp.float32(1.0)
            s = float(scale)
            if s == 1.0:
                factor = base
            elif s == 2.0:
                factor = base * base
            elif s == 0.5:
                factor = jnp.sqrt(base)
            else:
                factor = jnp.power(base, jnp.float32(s))
            loss_new = loss * factor
        else:
            raise ValueError(f'Invalid aggregate: {aggregate}')

        # Pack the three scalar results into one lane-dense (1, 128) row:
        # lane 0 = loss_final, lane 1 = penalty, lane 2 = normalized_penalty.
        lane = jax.lax.broadcasted_iota(jnp.int32, out_ref.shape, 1)
        row = jnp.where(lane == 0, loss_new,
              jnp.where(lane == 1, penalty,
              jnp.where(lane == 2, npen, jnp.float32(0.0))))
        out_ref[...] = row


def _choose_tile_d(D, O, itemsize):
    """Largest decision tile whose double-buffered blocks fit the VMEM budget.

    Returns (tile_d, needs_pad). If the whole table fits, take it as a single
    full-array block (no (8,128) divisibility constraint, no host padding).
    """
    bytes_per_row = 2 * 2 * O * itemsize          # 2 inputs x 2 buffers
    rows_in_budget = _VMEM_BLOCK_BUDGET // max(bytes_per_row, 1)
    if D <= rows_in_budget:
        return D, False
    tile = int(max(8, min(D, rows_in_budget)))
    tile = max(8, (tile // 8) * 8)                # sublane-aligned
    return tile, (D % tile) != 0


def profiler_penalty(loss, sample_probs, latency_table, *,
                     baseline, scale=1.0, nonlinear='linear', aggregate='add'):
    """Pallas equivalent of ProfilerPenalty.forward.

    loss:          scalar float32 (original loss)
    sample_probs:  (D, O) architecture-choice probabilities (f32 or bf16)
    latency_table: (D, O) per-op latency / cost table       (f32 or bf16)
    Returns (loss_new, details) like the PyTorch module.
    """
    assert sample_probs.shape == latency_table.shape
    D, O = sample_probs.shape

    itemsize = max(jnp.dtype(sample_probs.dtype).itemsize,
                   jnp.dtype(latency_table.dtype).itemsize)
    tile_d, needs_pad = _choose_tile_d(D, O, itemsize)

    if needs_pad:
        # Zero rows contribute nothing to the expected-latency sum.
        d_pad = (-D) % tile_d
        sample_probs = jnp.pad(sample_probs, ((0, d_pad), (0, 0)))
        latency_table = jnp.pad(latency_table, ((0, d_pad), (0, 0)))
        nd = (D + d_pad) // tile_d
    else:
        nd = D // tile_d if tile_d else 1
        nd = max(nd, 1)

    loss = jnp.asarray(loss, jnp.float32)
    loss_smem = jnp.reshape(loss, (1,))           # 32-bit scalar, lives in SMEM

    kernel = functools.partial(
        _penalty_kernel,
        baseline=float(baseline), scale=float(scale),
        nonlinear=nonlinear, aggregate=aggregate)

    table_spec = pl.BlockSpec((tile_d, O), lambda d: (d, 0))

    out = pl.pallas_call(
        kernel,
        out_shape=jax.ShapeDtypeStruct((1, 128), jnp.float32),
        grid_spec=pltpu.PrefetchScalarGridSpec(
            num_scalar_prefetch=0,
            grid=(nd,),
            in_specs=[
                pl.BlockSpec(memory_space=pltpu.MemorySpace.SMEM),  # scalar loss
                table_spec,
                table_spec,
            ],
            out_specs=pl.BlockSpec((1, 128), lambda d: (0, 0)),
            scratch_shapes=[pltpu.VMEM((1, O), jnp.float32)],
        ),
        compiler_params=pltpu.CompilerParams(
            dimension_semantics=("arbitrary",),     # reduction axis
            vmem_limit_bytes=_VMEM_LIMIT_BYTES),
    )(loss_smem, sample_probs, latency_table)

    loss_new = out[0, 0]
    penalty = out[0, 1]
    npen = out[0, 2]
    details = {
        'loss_original': loss,
        'penalty': penalty,
        'normalized_penalty': npen,
        'loss_final': loss_new,
    }
    return loss_new, details


def _reference(loss, sample_probs, latency_table, *,
               baseline, scale, nonlinear, aggregate):
    penalty = jnp.sum(sample_probs.astype(jnp.float32)
                      * latency_table.astype(jnp.float32))
    npen = penalty / baseline - 1.0
    npen = {
        'linear': lambda v: v,
        'positive': lambda v: jnp.maximum(v, 0.0),
        'negative': lambda v: -jnp.maximum(-v, 0.0),
        'absolute': lambda v: jnp.abs(v),
    }[nonlinear](npen)
    if aggregate == 'add':
        loss_new = loss + scale * npen
    else:
        loss_new = loss * jnp.power(npen + 1.0, scale)
    return loss_new, penalty, npen


if __name__ == "__main__":
    key = jax.random.PRNGKey(0)
    k1, k2, k3 = jax.random.split(key, 3)

    # Small synthetic NAS search space: 8 decisions x 128 candidate ops.
    D, O = 8, 128
    logits = jax.random.normal(k1, (D, O), dtype=jnp.float32)
    sample_probs = jax.nn.softmax(logits, axis=-1)              # architecture sample
    latency_table = jax.random.uniform(k2, (D, O), dtype=jnp.float32,
                                       minval=0.1, maxval=2.0)  # profiler cost table
    loss = jax.random.uniform(k3, (), dtype=jnp.float32, minval=0.5, maxval=2.0)

    # (baseline, scale) chosen so the penalty sits above (4.0) and below (16.0)
    # the baseline, exercising both signs of normalized_penalty.
    configs = [(4.0, 0.5, nl, ag)
               for nl in ('linear', 'positive', 'negative', 'absolute')
               for ag in ('add', 'mul')]
    configs += [(16.0, 2.0, 'linear', 'add'), (16.0, 2.0, 'linear', 'mul')]

    ok = True
    for baseline, scale, nonlinear, aggregate in configs:
        loss_new, details = profiler_penalty(
            loss, sample_probs, latency_table,
            baseline=baseline, scale=scale,
            nonlinear=nonlinear, aggregate=aggregate)
        loss_new = jax.block_until_ready(loss_new)
        ref_loss, ref_pen, ref_npen = _reference(
            loss, sample_probs, latency_table,
            baseline=baseline, scale=scale,
            nonlinear=nonlinear, aggregate=aggregate)
        if not (jnp.allclose(loss_new, ref_loss, rtol=1e-5, atol=1e-5)
                and jnp.allclose(details['penalty'], ref_pen, rtol=1e-5, atol=1e-5)
                and jnp.allclose(details['normalized_penalty'], ref_npen,
                                 rtol=1e-5, atol=1e-5)):
            ok = False

    if ok:
        print("KERNEL_OK")
</pallas_src>

<mosaic_0001>
module attributes {stable_mosaic.version = 11 : i64} {
  func.func @_penalty_kernel(%arg0: i32, %arg1: memref<1xf32, #tpu.memory_space<smem>>, %arg2: memref<8x128xf32, #tpu.memory_space<vmem>>, %arg3: memref<8x128xf32, #tpu.memory_space<vmem>>, %arg4: memref<1x128xf32, #tpu.memory_space<vmem>>, %arg5: memref<1x128xf32, #tpu.memory_space<vmem>>) attributes {dimension_semantics = [#tpu.dimension_semantics<arbitrary>], iteration_bounds = array<i64: 1>, scalar_prefetch = 0 : i64, scratch_operands = 1 : i64, tpu.core_type = #tpu.core_type<tc>, window_params = [{transform_indices = @transform_0, window_bounds = array<i64: 1>}, {transform_indices = @transform_1, window_bounds = array<i64: 8, 128>}, {transform_indices = @transform_2, window_bounds = array<i64: 8, 128>}, {pipeline_mode = #tpu.pipeline_mode<synchronous>, transform_indices = @transform_3, window_bounds = array<i64: 1, 128>}]} {
    %c0_i32 = arith.constant 0 : i32
    %0 = arith.cmpi eq, %arg0, %c0_i32 : i32
    %1 = arith.extui %0 : i1 to i32
    %c0_i32_0 = arith.constant 0 : i32
    %2 = arith.cmpi ne, %1, %c0_i32_0 : i32
    scf.if %2 {
      %cst_10 = arith.constant 0.000000e+00 : f32
      %14 = vector.broadcast %cst_10 : f32 to vector<1x128xf32>
      %c0_11 = arith.constant 0 : index
      %c0_12 = arith.constant 0 : index
      %15 = vector.load %arg5[%c0_11, %c0_12] : memref<1x128xf32, #tpu.memory_space<vmem>>, vector<1x128xf32>
      tpu.vector_store %arg5[%c0_11, %c0_12], %14 {strides = array<i32>} : memref<1x128xf32, #tpu.memory_space<vmem>>, vector<1x128xf32>,
    } else {
    }
    %c0 = arith.constant 0 : index
    %c0_1 = arith.constant 0 : index
    %3 = vector.load %arg2[%c0, %c0_1] : memref<8x128xf32, #tpu.memory_space<vmem>>, vector<8x128xf32>
    %c0_2 = arith.constant 0 : index
    %c0_3 = arith.constant 0 : index
    %4 = vector.load %arg3[%c0_2, %c0_3] : memref<8x128xf32, #tpu.memory_space<vmem>>, vector<8x128xf32>
    %5 = arith.mulf %3, %4 : vector<8x128xf32>
    %c0_4 = arith.constant 0 : index
    %c0_5 = arith.constant 0 : index
    %6 = vector.load %arg5[%c0_4, %c0_5] : memref<1x128xf32, #tpu.memory_space<vmem>>, vector<1x128xf32>
    %cst = arith.constant dense<0.000000e+00> : vector<128xf32>
    %7 = vector.multi_reduction <add>, %5, %cst [0] : vector<8x128xf32> to vector<128xf32>
    %8 = vector.shape_cast %7 : vector<128xf32> to vector<1x128xf32>
    %9 = arith.addf %6, %8 : vector<1x128xf32>
    %c0_6 = arith.constant 0 : index
    %c0_7 = arith.constant 0 : index
    %10 = vector.load %arg5[%c0_6, %c0_7] : memref<1x128xf32, #tpu.memory_space<vmem>>, vector<1x128xf32>
    tpu.vector_store %arg5[%c0_6, %c0_7], %9 {strides = array<i32>} : memref<1x128xf32, #tpu.memory_space<vmem>>, vector<1x128xf32>,
    %c0_i32_8 = arith.constant 0 : i32
    %11 = arith.cmpi eq, %arg0, %c0_i32_8 : i32
    %12 = arith.extui %11 : i1 to i32
    %c0_i32_9 = arith.constant 0 : i32
    %13 = arith.cmpi ne, %12, %c0_i32_9 : i32
    scf.if %13 {
      %c0_10 = arith.constant 0 : index
      %c0_11 = arith.constant 0 : index
      %14 = vector.load %arg5[%c0_10, %c0_11] : memref<1x128xf32, #tpu.memory_space<vmem>>, vector<1x128xf32>
      %15 = vector.shape_cast %14 : vector<1x128xf32> to vector<1x1x128xf32>
      %cst_12 = arith.constant dense<0.000000e+00> : vector<1xf32>
      %16 = vector.multi_reduction <add>, %15, %cst_12 [1, 2] : vector<1x1x128xf32> to vector<1xf32>
      %17 = vector.shape_cast %16 : vector<1xf32> to vector<1x1x1xf32>
      %18 = vector.extract %17[0, 0, 0] : f32 from vector<1x1x1xf32>
      %cst_13 = arith.constant 4.000000e+00 : f32
      %19 = arith.divf %18, %cst_13 : f32
      %cst_14 = arith.constant 1.000000e+00 : f32
      %20 = arith.subf %19, %cst_14 : f32
      %c0_15 = arith.constant 0 : index
      %21 = memref.load %arg1[%c0_15] : memref<1xf32, #tpu.memory_space<smem>>
      %cst_16 = arith.constant 5.000000e-01 : f32
      %22 = arith.mulf %cst_16, %20 : f32
      %23 = arith.addf %21, %22 : f32
      %24 = tpu.iota {dimensions = array<i32: 1>} : vector<1x128xi32>
      %c0_i32_17 = arith.constant 0 : i32
      %25 = vector.broadcast %c0_i32_17 : i32 to vector<1x128xi32>
      %26 = arith.cmpi eq, %24, %25 : vector<1x128xi32>
      %c1_i32 = arith.constant 1 : i32
      %27 = vector.broadcast %c1_i32 : i32 to vector<1x128xi32>
      %28 = arith.cmpi eq, %24, %27 : vector<1x128xi32>
      %c2_i32 = arith.constant 2 : i32
      %29 = vector.broadcast %c2_i32 : i32 to vector<1x128xi32>
      %30 = arith.cmpi eq, %24, %29 : vector<1x128xi32>
      %cst_18 = arith.constant 0.000000e+00 : f32
      %31 = vector.broadcast %20 : f32 to vector<1x128xf32>
      %32 = vector.broadcast %cst_18 : f32 to vector<1x128xf32>
      %33 = arith.select %30, %31, %32 : vector<1x128xi1>, vector<1x128xf32>
      %34 = vector.broadcast %18 : f32 to vector<1x128xf32>
      %35 = arith.select %28, %34, %33 : vector<1x128xi1>, vector<1x128xf32>
      %36 = vector.broadcast %23 : f32 to vector<1x128xf32>
      %37 = arith.select %26, %36, %35 : vector<1x128xi1>, vector<1x128xf32>
      %c0_19 = arith.constant 0 : index
      %c0_20 = arith.constant 0 : index
      %38 = vector.load %arg4[%c0_19, %c0_20] : memref<1x128xf32, #tpu.memory_space<vmem>>, vector<1x128xf32>
      tpu.vector_store %arg4[%c0_19, %c0_20], %37 {strides = array<i32>} : memref<1x128xf32, #tpu.memory_space<vmem>>, vector<1x128xf32>,
    } else {
    }
    return
  }
  func.func @transform_0(%arg0: i32) -> i32 {
    %c0_i32 = arith.constant 0 : i32
    %c0_i32_0 = arith.constant 0 : i32
    return %c0_i32 : i32
  }
  func.func @transform_1(%arg0: i32) -> (i32, i32) {
    %c0_i32 = arith.constant 0 : i32
    %c0_i32_0 = arith.constant 0 : i32
    return %arg0, %c0_i32 : i32, i32
  }
  func.func @transform_2(%arg0: i32) -> (i32, i32) {
    %c0_i32 = arith.constant 0 : i32
    %c0_i32_0 = arith.constant 0 : i32
    return %arg0, %c0_i32 : i32, i32
  }
  func.func @transform_3(%arg0: i32) -> (i32, i32) {
    %c0_i32 = arith.constant 0 : i32
    %c0_i32_0 = arith.constant 0 : i32
    %c0_i32_1 = arith.constant 0 : i32
    return %c0_i32, %c0_i32_0 : i32, i32
  }
}

</mosaic_0001>

<bundles_post_ra>
// kernel: tpu_custom_call.1
= control target key start
LH: loop header
LB: loop body
LE: loop exit
PB: predicated region body
PF: predicated region fallthrough
CT: control target
= control target key end

     0   :  { %9 = vsyncpa [#allocation5], 0  ;;  %s246_s0 = inlined_call_operand.<no memory space> [shape: f32[1], index: 0, kind: input, shape index: {}]   ;;  %s247_s1 = inlined_call_operand.hbm [shape: f32[8,128], index: 1, kind: input, shape index: {}]   ;;  %s248_s2 = inlined_call_operand.hbm [shape: f32[8,128], index: 2, kind: input, shape index: {}]   ;;  %s249_s3 = inlined_call_operand.hbm [shape: f32[1,128], index: 3, kind: output, shape index: {}]  }
   0x1   :  { %10 = vsyncpa [#allocation8], 0 }
   0x2   :  { %11 = vsyncpa [#allocation6], 0  ;;  %s19_s14 = sshll.u32 %s247_s1, 4  ;;  %s209_s15 = smov [#allocation4]   ;;  %s20_s14 = int_to_ptr.hbm [resolvable:$true] %s19_s14 }
   0x3   :  { %s21_s16 = sshll.u32 %s209_s15, 4  ;;  %s30_s19 = sshll.u32 %s248_s2, 4  ;;  %s22_s16 = int_to_ptr.vmem [resolvable:$true] %s21_s16  ;;  %s31_s19 = int_to_ptr.hbm [resolvable:$true] %s30_s19 }
   0x4   :  { %24 = dma.hbm_to_vmem [thread:$0]  %s20_s14, 128, %s22_s16, [#allocation5]  }
   0x5   :  { %s210_s20 = smov [#allocation7]  }
   0x6   :  { %s32_s21 = sshll.u32 %s210_s20, 4  ;;  %s33_s21 = int_to_ptr.vmem [resolvable:$true] %s32_s21 }
   0x7   :  { %35 = dma.hbm_to_vmem [thread:$0]  %s31_s19, 128, %s33_s21, [#allocation8]  }
   0x8   :  { %203 = dma.done.wait [#allocation5], 128  }
   0x9   :  { %204 = vsyncadd [#allocation5], 4294967168 }
   0xa   :  { %205 = dma.done.wait [#allocation8], 128  }
   0xb   :  { %206 = vsyncadd [#allocation8], 4294967168  ;;  %v211_v0 = vmov 0.0   ;;  %v49_v1 = vld [vmem:[#allocation4] sm:$0xff]  ;;  %v50_v2 = vld [vmem:[#allocation7] sm:$0xff]  ;;  %vm65_vm0 = vcmask 1040384   ;;  %v89_v28 = vlaneseq }
   0xc   :  { %48 = vst [vmem:[#allocation2] sm:$0x1] %v211_v0  ;;  %v51_v3 = vmul.f32 %v50_v2, %v49_v1  ;;  %v212_v14 = vmov 4.0   ;;  %s213_s25 = smov [#allocation9]   ;;  %s108_s29 = sshll.u32 %s249_s3, 4  ;;  %s109_s29 = int_to_ptr.hbm [resolvable:$true] %s108_s29 }
   0xd   :  { %129 = vrcp.f32 %v212_v14  ;;  %v90_v29 = vand.u32 127, %v89_v28  ;;  %s106_s26 = sshll.u32 %s213_s25, 4  ;;  %s107_s26 = int_to_ptr.vmem [resolvable:$true] %s106_s26 }
   0xe   :  { %v53_v4 = vrot.slane %v51_v3, 4 }
   0xf   :  { %vm93_vm2 = vcmp.eq.s32.totalorder %v90_v29, 2  ;;  %vm92_vm3 = vcmp.eq.s32.totalorder %v90_v29, 1  ;;  %vm91_vm4 = vcmp.eq.s32.totalorder %v90_v29, 0 }
  0x10   :  { %v54_v5 = vadd.f32 %v53_v4, %v51_v3 }
  0x12   :  { %v55_v6 = vrot.slane %v54_v5, 2 }
  0x13   :  { %v52_v9 = vld [vmem:[#allocation2] sm:$0x1]  ;;  %v130_v15 = vpop.eup %129 }
  0x14   :  { %v56_v7 = vadd.f32 %v55_v6, %v54_v5  ;;  %v77_v16 = vmul.f32 4.0, %v130_v15  ;;  %vm81_vm1 = vweird.f32 %v130_v15 }
  0x16   :  { %v57_v8 = vrot.slane %v56_v7, 1  ;;  %v78_v17 = vsub.f32 1.0, %v77_v16 }
  0x18   :  { %v58_v10 = vadd.f32 %v57_v8, %v56_v7  ;;  %v79_v21 = vmul.f32 %v130_v15, %v78_v17 }
  0x1a   :  { %v59_v11 = vadd.f32 %v58_v10, %v52_v9  ;;  %v80_v24 = vadd.f32 %v130_v15, %v79_v21 }
  0x1c   :  { %60 = vst [vmem:[#allocation2] sm:$0x1] %v59_v11  ;;  %v82_v27 = vsel %vm81_vm1, %v130_v15, %v80_v24 }
  0x23   :  { %v64_v12 = vld [vmem:[#allocation2] sm:$0x1] }
  0x24   :  { %v66_v13 = vsel %vm65_vm0, %v64_v12, 0.0 }
  0x25   :  { %67 = vadd.xlane.f32.xlu0 %v66_v13 }
  0x98   :  { %v68_v18 = vpop.xlane.xlu0 %67 }
  0x99   :  { %v69_v19 = vrot.slane %v68_v18, 4 }
  0x9b   :  { %v70_v20 = vadd.f32 %v69_v19, %v68_v18 }
  0x9d   :  { %v71_v22 = vrot.slane %v70_v20, 2 }
  0x9f   :  { %v72_v23 = vadd.f32 %v71_v22, %v70_v20 }
  0xa1   :  { %v73_v25 = vrot.slane %v72_v23, 1 }
  0xa3   :  { %v74_v26 = vadd.f32 %v73_v25, %v72_v23 }
  0xa5   :  { %120 = vpush %v74_v26 }
  0xa6   :  { %122 = vpush %v82_v27 }
  0xd6   :  { %s121_s1 = spop %120 }
  0xd7   :  { %s123_s2 = spop %122  ;;  %v96_v32 = vstv %s121_s1 }
  0xd8   :  { %s84_s22 = smul.f32 %s123_s2, %s121_s1 }
  0xda   :  { %s119_s23 = sadd.f32 -1.0, %s84_s22 }
  0xdc   :  { %s87_s24 = smul.f32 0.5, %s119_s23  ;;  %v94_v30 = vstv %s119_s23 }
  0xdd   :  { %v95_v31 = vsel %vm93_vm2, %v94_v30, 0.0 }
  0xde   :  { %s88_s5 = sadd.f32 %s87_s24, %s246_s0  ;;  %v97_v33 = vsel %vm92_vm3, %v96_v32, %v95_v31 }
  0xe0   :  { %v98_v34 = vstv %s88_s5 }
  0xe1   :  { %v99_v35 = vsel %vm91_vm4, %v98_v34, %v97_v33 }
  0xe2   :  { %100 = vst [vmem:[#allocation9] sm:$0x1] %v99_v35 }
  0xe3   :  { %111 = dma.vmem_to_hbm [thread:$0]  %s107_s26, 16, %s109_s29, [#allocation6]  }
  0xe4   :  { %207 = dma.done.wait [#allocation6], 16  }
  0xe5   :  { %208 = vsyncadd [#allocation6], 4294967280 }
  0xe6   :  { %116 = vsyncpa [#allocation5], 1 }
  0xe7   :  { %117 = vsyncpa [#allocation8], 1 }
  0xe8   :  { %118 = vsyncpa [#allocation6], 1 }

</bundles_post_ra>
